<compile_context>
chip_gen: v7x
topology: tpu7x:2x2x1
jax: 0.10.0
libtpu: 0.0.40
codegen_flags: <defaults>
</compile_context>

<pallas_src>
import jax
import jax.numpy as jnp
from jax.experimental import pallas as pl
from jax.experimental.pallas import tpu as pltpu

_LANE = 128      # lane width: pad feature dims to multiples of this
_SUBLANE = 8     # sublane count: pad batch dim to multiples of this


def _round_up(n, m):
    return (n + m - 1) // m * m


def _full_spec(shape):
    # Whole-array block resident in VMEM (all shapes here are tiny).
    return pl.BlockSpec(shape, lambda: (0,) * len(shape))


# ----------------------------- fused Pallas kernel ---------------------------

def _make_fused_kernel(n_layers, bn_relu, real_out, b_real, b_pad):
    """Build a fused MLP kernel.

    n_layers : number of linear layers (static)
    bn_relu  : tuple[bool], whether BN+ReLU follows linear layer i
    real_out : tuple[int], un-padded output width of linear layer i
    b_real   : real batch size (for BN statistics)
    b_pad    : sublane-padded batch size of the blocks
    """

    def kernel(x_ref, *refs):
        o_ref = refs[-1]
        wb = refs[:-1]  # 2 * n_layers refs: (w0, b0, w1, b1, ...)
        y = x_ref[...]

        # Row mask (only needed when the batch dim was padded): padded rows
        # must not contribute to the BatchNorm statistics.
        if b_pad != b_real:
            row = jax.lax.broadcasted_iota(jnp.int32, (b_pad, 1), 0)
            row_mask = row < b_real
        else:
            row_mask = None
        inv_b = jnp.float32(1.0 / b_real)

        for i in range(n_layers):
            w_ref = wb[2 * i]
            b_ref = wb[2 * i + 1]
            # y = y @ W + b   (MXU, f32 accumulation; padded columns stay 0+0=0)
            y = jnp.dot(y, w_ref[...], preferred_element_type=jnp.float32)
            y = y + b_ref[...]
            if bn_relu[i]:
                # BatchNorm1d(eps=0, affine=False, track_running_stats=False):
                # per-batch mean / biased variance (exact two-pass formula, as
                # in torch) over the *real* batch rows only.
                ym = y if row_mask is None else jnp.where(row_mask, y, 0.0)
                mean = jnp.sum(ym, axis=0, keepdims=True) * inv_b
                cen = y - mean
                cen_m = cen if row_mask is None else jnp.where(row_mask, cen, 0.0)
                var = jnp.sum(cen_m * cen_m, axis=0, keepdims=True) * inv_b
                inv = jax.lax.rsqrt(var)  # eps == 0 (matches the torch config)
                n_pad = y.shape[1]
                nr = real_out[i]
                if nr < n_pad:
                    # Padded lanes have var == 0 -> rsqrt == inf; force them to
                    # exactly 0 so nothing leaks into the next matmul.
                    col = jax.lax.broadcasted_iota(jnp.int32, (1, n_pad), 1)
                    inv = jnp.where(col < nr, inv, 0.0)
                y = jnp.maximum(cen * inv, 0.0)
        o_ref[...] = y.astype(o_ref.dtype)

    return kernel


# ------------------------------- FC640 module --------------------------------

class FC640:
    def __init__(self, num_hidden_units, dim_output=None):
        self.dim_output = dim_output
        self.dim_input = 640
        self.num_hidden_units = list(num_hidden_units)
        self.num_layers = len(num_hidden_units)

        # Static per-linear-layer description (mirrors the torch forward()).
        dims = [self.dim_input] + self.num_hidden_units
        self._layer_in = []
        self._layer_out = []
        self._bn_relu = []
        for i in range(self.num_layers):
            self._layer_in.append(dims[i])
            self._layer_out.append(dims[i + 1])
            # BN+ReLU follows every hidden linear; the num_layers-th linear gets
            # BN+ReLU only when an extra output projection exists.
            self._bn_relu.append(i < self.num_layers - 1 or dim_output is not None)
        if dim_output is not None:
            self._layer_in.append(self.num_hidden_units[-1])
            self._layer_out.append(dim_output)
            self._bn_relu.append(False)

        self._pack_key = None
        self._packed = None
        self._fwd_cache = {}   # keyed by batch size -> jitted forward fn

    # ----- weights -----------------------------------------------------------
    def get_weight_shape(self):
        w_shape = {}
        dims = [self.dim_input] + self.num_hidden_units
        for i in range(self.num_layers):
            w_shape["w{:d}".format(i + 1)] = (dims[i + 1], dims[i])
            w_shape["b{:d}".format(i + 1)] = (dims[i + 1],)
        if self.dim_output is not None:
            w_shape["w{:d}".format(self.num_layers + 1)] = (
                self.dim_output, self.num_hidden_units[-1])
            w_shape["b{:d}".format(self.num_layers + 1)] = (self.dim_output,)
        return w_shape

    def initialize_weights(self, key):
        # kaiming_normal_ equivalent: std = sqrt(2 / fan_in), biases zero.
        w = {}
        for name, shape in self.get_weight_shape().items():
            if name.startswith("w"):
                key, sub = jax.random.split(key)
                std = jnp.sqrt(2.0 / shape[1])
                w[name] = std * jax.random.normal(sub, shape, dtype=jnp.float32)
            else:
                w[name] = jnp.zeros(shape, dtype=jnp.float32)
        return w

    # ----- one-time weight packing (transpose + lane padding), cached --------
    def _pack(self, w):
        packed = []
        for i in range(len(self._layer_out)):
            W = jnp.asarray(w["w{:d}".format(i + 1)], dtype=jnp.float32)  # (N, K)
            b = jnp.asarray(w["b{:d}".format(i + 1)], dtype=jnp.float32)  # (N,)
            K, N = self._layer_in[i], self._layer_out[i]
            Kp, Np = _round_up(K, _LANE), _round_up(N, _LANE)
            Wt = jnp.zeros((Kp, Np), jnp.float32).at[:K, :N].set(W.T)
            bp = jnp.zeros((1, Np), jnp.float32).at[:, :N].set(b)
            packed.append((Wt, bp))
        return packed

    def _packed_params(self, w):
        key = tuple(id(w[k]) for k in sorted(w.keys()))
        if self._pack_key != key:
            self._packed = self._pack(w)
            self._pack_key = key
        return self._packed

    # ----- jitted (pad -> fused pallas_call -> slice), cached per batch size -
    def _forward_fn(self, B):
        fn = self._fwd_cache.get(B)
        if fn is not None:
            return fn

        bn_relu = tuple(self._bn_relu)
        real_out = tuple(self._layer_out)
        n_layers = len(real_out)
        Kp = _round_up(self.dim_input, _LANE)
        Bp = _round_up(max(B, 1), _SUBLANE)
        out_pad = _round_up(real_out[-1], _LANE)
        kernel = _make_fused_kernel(n_layers, bn_relu, real_out, B, Bp)

        def fwd(x, *wb):
            x = x.astype(jnp.float32)
            pad_r = Bp - x.shape[0]
            pad_c = Kp - x.shape[1]
            x_pad = jnp.pad(x, ((0, pad_r), (0, pad_c))) if (pad_r or pad_c) else x

            in_specs = [_full_spec((Bp, Kp))]
            flops = 0
            transcendentals = 0
            bytes_accessed = Bp * Kp * 4 + Bp * out_pad * 4
            for i in range(n_layers):
                wt, bp = wb[2 * i], wb[2 * i + 1]
                in_specs += [_full_spec(wt.shape), _full_spec(bp.shape)]
                flops += 2 * Bp * wt.shape[0] * wt.shape[1]
                bytes_accessed += (wt.size + bp.size) * 4
                if bn_relu[i]:
                    transcendentals += wt.shape[1]  # one rsqrt per feature col

            out = pl.pallas_call(
                kernel,
                out_shape=jax.ShapeDtypeStruct((Bp, out_pad), jnp.float32),
                in_specs=in_specs,
                out_specs=_full_spec((Bp, out_pad)),
                compiler_params=pltpu.CompilerParams(
                    vmem_limit_bytes=32 * 1024 * 1024),
                cost_estimate=pl.CostEstimate(
                    flops=int(flops),
                    transcendentals=int(transcendentals),
                    bytes_accessed=int(bytes_accessed),
                ),
            )(x_pad, *wb)
            return out[:B, : real_out[-1]]

        fn = jax.jit(fwd)
        self._fwd_cache[B] = fn
        return fn

    # ----- forward ------------------------------------------------------------
    def forward(self, x, w, p_dropout=0.0):
        # TODO(synk): stochastic dropout (p_dropout > 0) is not implemented
        # in-kernel; at the default p=0 dropout is the identity.
        packed = self._packed_params(w)
        x = jnp.asarray(x, dtype=jnp.float32)
        flat = []
        for wt, bp in packed:
            flat += [wt, bp]
        return self._forward_fn(x.shape[0])(x, *flat)


# ----------------------------- pure-JAX reference ----------------------------

def _ref_forward(model, x, w):
    def bn_relu(y):
        m = jnp.mean(y, axis=0, keepdims=True)
        v = jnp.mean((y - m) ** 2, axis=0, keepdims=True)
        return jnp.maximum((y - m) / jnp.sqrt(v), 0.0)

    out = x
    for i in range(model.num_layers - 1):
        out = bn_relu(out @ w[f"w{i+1}"].T + w[f"b{i+1}"])
    out = out @ w[f"w{model.num_layers}"].T + w[f"b{model.num_layers}"]
    if model.dim_output is not None:
        out = bn_relu(out)
        out = out @ w[f"w{model.num_layers+1}"].T + w[f"b{model.num_layers+1}"]
    return out


# ----------------------------------- main -------------------------------------

if __name__ == "__main__":
    key = jax.random.PRNGKey(0)
    kx, kw = jax.random.split(key)

    batch = 8
    model = FC640(num_hidden_units=[128, 64], dim_output=32)
    w = model.initialize_weights(kw)

    x = jax.random.normal(kx, (batch, model.dim_input), dtype=jnp.float32)

    out = model.forward(x, w)          # packs weights + compiles fused kernel
    out = model.forward(x, w)          # second call reuses cached pack + jit
    out = jax.block_until_ready(out)

    ref = _ref_forward(model, x, w)
    assert out.shape == (batch, model.dim_output), out.shape
    assert jnp.allclose(out, ref, atol=1e-4, rtol=1e-4), "mismatch vs reference"

    print("KERNEL_OK")
</pallas_src>

<mosaic_0001>
module attributes {stable_mosaic.version = 11 : i64} {
  func.func @kernel(%arg0: memref<8x640xf32, #tpu.memory_space<vmem>>, %arg1: memref<640x128xf32, #tpu.memory_space<vmem>>, %arg2: memref<1x128xf32, #tpu.memory_space<vmem>>, %arg3: memref<128x128xf32, #tpu.memory_space<vmem>>, %arg4: memref<1x128xf32, #tpu.memory_space<vmem>>, %arg5: memref<128x128xf32, #tpu.memory_space<vmem>>, %arg6: memref<1x128xf32, #tpu.memory_space<vmem>>, %arg7: memref<8x128xf32, #tpu.memory_space<vmem>>) attributes {dimension_semantics = [], scalar_prefetch = 0 : i64, scratch_operands = 0 : i64, tpu.core_type = #tpu.core_type<tc>} {
    %c0 = arith.constant 0 : index
    %c0_0 = arith.constant 0 : index
    %0 = vector.load %arg0[%c0, %c0_0] : memref<8x640xf32, #tpu.memory_space<vmem>>, vector<8x640xf32>
    %c0_1 = arith.constant 0 : index
    %c0_2 = arith.constant 0 : index
    %1 = vector.load %arg1[%c0_1, %c0_2] : memref<640x128xf32, #tpu.memory_space<vmem>>, vector<640x128xf32>
    %cst = arith.constant dense<0.000000e+00> : vector<8x128xf32>
    %2 = tpu.matmul %0, %1, %cst {dimension_numbers = #tpu.dot_dimension_numbers<[1], [0], [0], [1], [0, 0, 1, 1], [], []>} : vector<8x640xf32>, vector<640x128xf32>, vector<8x128xf32> -> vector<8x128xf32>
    %c0_3 = arith.constant 0 : index
    %c0_4 = arith.constant 0 : index
    %3 = vector.load %arg2[%c0_3, %c0_4] : memref<1x128xf32, #tpu.memory_space<vmem>>, vector<1x128xf32>
    %4 = vector.broadcast %3 : vector<1x128xf32> to vector<8x128xf32>
    %5 = arith.addf %2, %4 : vector<8x128xf32>
    %cst_5 = arith.constant dense<0.000000e+00> : vector<128xf32>
    %6 = vector.multi_reduction <add>, %5, %cst_5 [0] : vector<8x128xf32> to vector<128xf32>
    %7 = vector.shape_cast %6 : vector<128xf32> to vector<1x128xf32>
    %cst_6 = arith.constant 1.250000e-01 : f32
    %8 = vector.broadcast %cst_6 : f32 to vector<1x128xf32>
    %9 = arith.mulf %7, %8 : vector<1x128xf32>
    %10 = vector.broadcast %9 : vector<1x128xf32> to vector<8x128xf32>
    %11 = arith.subf %5, %10 : vector<8x128xf32>
    %12 = arith.mulf %11, %11 : vector<8x128xf32>
    %cst_7 = arith.constant dense<0.000000e+00> : vector<128xf32>
    %13 = vector.multi_reduction <add>, %12, %cst_7 [0] : vector<8x128xf32> to vector<128xf32>
    %14 = vector.shape_cast %13 : vector<128xf32> to vector<1x128xf32>
    %cst_8 = arith.constant 1.250000e-01 : f32
    %15 = vector.broadcast %cst_8 : f32 to vector<1x128xf32>
    %16 = arith.mulf %14, %15 : vector<1x128xf32>
    %17 = math.rsqrt %16 : vector<1x128xf32>
    %18 = vector.broadcast %17 : vector<1x128xf32> to vector<8x128xf32>
    %19 = arith.mulf %11, %18 : vector<8x128xf32>
    %cst_9 = arith.constant 0.000000e+00 : f32
    %20 = vector.broadcast %cst_9 : f32 to vector<8x128xf32>
    %21 = arith.maximumf %19, %20 : vector<8x128xf32>
    %c0_10 = arith.constant 0 : index
    %c0_11 = arith.constant 0 : index
    %22 = vector.load %arg3[%c0_10, %c0_11] : memref<128x128xf32, #tpu.memory_space<vmem>>, vector<128x128xf32>
    %cst_12 = arith.constant dense<0.000000e+00> : vector<8x128xf32>
    %23 = tpu.matmul %21, %22, %cst_12 {dimension_numbers = #tpu.dot_dimension_numbers<[1], [0], [0], [1], [0, 0, 1, 1], [], []>} : vector<8x128xf32>, vector<128x128xf32>, vector<8x128xf32> -> vector<8x128xf32>
    %c0_13 = arith.constant 0 : index
    %c0_14 = arith.constant 0 : index
    %24 = vector.load %arg4[%c0_13, %c0_14] : memref<1x128xf32, #tpu.memory_space<vmem>>, vector<1x128xf32>
    %25 = vector.broadcast %24 : vector<1x128xf32> to vector<8x128xf32>
    %26 = arith.addf %23, %25 : vector<8x128xf32>
    %cst_15 = arith.constant dense<0.000000e+00> : vector<128xf32>
    %27 = vector.multi_reduction <add>, %26, %cst_15 [0] : vector<8x128xf32> to vector<128xf32>
    %28 = vector.shape_cast %27 : vector<128xf32> to vector<1x128xf32>
    %cst_16 = arith.constant 1.250000e-01 : f32
    %29 = vector.broadcast %cst_16 : f32 to vector<1x128xf32>
    %30 = arith.mulf %28, %29 : vector<1x128xf32>
    %31 = vector.broadcast %30 : vector<1x128xf32> to vector<8x128xf32>
    %32 = arith.subf %26, %31 : vector<8x128xf32>
    %33 = arith.mulf %32, %32 : vector<8x128xf32>
    %cst_17 = arith.constant dense<0.000000e+00> : vector<128xf32>
    %34 = vector.multi_reduction <add>, %33, %cst_17 [0] : vector<8x128xf32> to vector<128xf32>
    %35 = vector.shape_cast %34 : vector<128xf32> to vector<1x128xf32>
    %cst_18 = arith.constant 1.250000e-01 : f32
    %36 = vector.broadcast %cst_18 : f32 to vector<1x128xf32>
    %37 = arith.mulf %35, %36 : vector<1x128xf32>
    %38 = math.rsqrt %37 : vector<1x128xf32>
    %39 = tpu.iota {dimensions = array<i32: 1>} : vector<1x128xi32>
    %c64_i32 = arith.constant 64 : i32
    %40 = vector.broadcast %c64_i32 : i32 to vector<1x128xi32>
    %41 = arith.cmpi slt, %39, %40 : vector<1x128xi32>
    %cst_19 = arith.constant 0.000000e+00 : f32
    %42 = vector.broadcast %cst_19 : f32 to vector<1x128xf32>
    %43 = arith.select %41, %38, %42 : vector<1x128xi1>, vector<1x128xf32>
    %44 = vector.broadcast %43 : vector<1x128xf32> to vector<8x128xf32>
    %45 = arith.mulf %32, %44 : vector<8x128xf32>
    %cst_20 = arith.constant 0.000000e+00 : f32
    %46 = vector.broadcast %cst_20 : f32 to vector<8x128xf32>
    %47 = arith.maximumf %45, %46 : vector<8x128xf32>
    %c0_21 = arith.constant 0 : index
    %c0_22 = arith.constant 0 : index
    %48 = vector.load %arg5[%c0_21, %c0_22] : memref<128x128xf32, #tpu.memory_space<vmem>>, vector<128x128xf32>
    %cst_23 = arith.constant dense<0.000000e+00> : vector<8x128xf32>
    %49 = tpu.matmul %47, %48, %cst_23 {dimension_numbers = #tpu.dot_dimension_numbers<[1], [0], [0], [1], [0, 0, 1, 1], [], []>} : vector<8x128xf32>, vector<128x128xf32>, vector<8x128xf32> -> vector<8x128xf32>
    %c0_24 = arith.constant 0 : index
    %c0_25 = arith.constant 0 : index
    %50 = vector.load %arg6[%c0_24, %c0_25] : memref<1x128xf32, #tpu.memory_space<vmem>>, vector<1x128xf32>
    %51 = vector.broadcast %50 : vector<1x128xf32> to vector<8x128xf32>
    %52 = arith.addf %49, %51 : vector<8x128xf32>
    %c0_26 = arith.constant 0 : index
    %c0_27 = arith.constant 0 : index
    %53 = vector.load %arg7[%c0_26, %c0_27] : memref<8x128xf32, #tpu.memory_space<vmem>>, vector<8x128xf32>
    tpu.vector_store %arg7[%c0_26, %c0_27], %52 {strides = array<i32>} : memref<8x128xf32, #tpu.memory_space<vmem>>, vector<8x128xf32>,
    return
  }
}

</mosaic_0001>

<bundles_post_ra>
// kernel: fwd.1
= control target key start
LH: loop header
LB: loop body
LE: loop exit
PB: predicated region body
PF: predicated region fallthrough
CT: control target
= control target key end

     0   :  { %12 = vsyncpa [#allocation3], 0  ;;  %s1280_s0 = inlined_call_operand.hbm [shape: f32[8,640], index: 0, kind: input, shape index: {}]   ;;  %s1281_s1 = inlined_call_operand.hbm [shape: f32[640,128], index: 1, kind: input, shape index: {}]   ;;  %s1282_s2 = inlined_call_operand.vmem [shape: f32[1,128], index: 2, kind: input, shape index: {}]   ;;  %s1283_s3 = inlined_call_operand.hbm [shape: f32[128,128], index: 3, kind: input, shape index: {}]   ;;  %s1284_s4 = inlined_call_operand.vmem [shape: f32[1,128], index: 4, kind: input, shape index: {}]   ;;  %s1285_s5 = inlined_call_operand.hbm [shape: f32[128,128], index: 5, kind: input, shape index: {}]   ;;  %s1286_s6 = inlined_call_operand.vmem [shape: f32[1,128], index: 6, kind: input, shape index: {}]   ;;  %s1287_s7 = inlined_call_operand.hbm [shape: f32[8,128], index: 7, kind: output, shape index: {}]  }
   0x1   :  { %13 = vsyncpa [#allocation6], 0 }
   0x2   :  { %14 = vsyncpa [#allocation9], 0 }
   0x3   :  { %15 = vsyncpa [#allocation4], 0  ;;  %s1125_s24 = smov [#allocation5]   ;;  %s1007_s28 = scalar_lea.hbm %s1281_s1, 10240 }
   0x4   :  { %s31_s25 = sshll.u32 %s1125_s24, 4  ;;  %p1008_p0 = scmp.ne.s32.totalorder %s1281_s1, %s1007_s28  ;;  %s32_s25 = int_to_ptr.vmem [resolvable:$true] %s31_s25 }
   0x5   :  { %p1011_p1 = scmp.lt.u32.totalorder %s1007_s28, %s1281_s1 }
   0x7   :  { %p1013_p2 = pnand %p1011_p1, %p1008_p0 }
   0x9   :  { %1016 = shalt.err (!%p1013_p2)
}
   0xa   :  { %s1017_s10 = scalar_lea.vmem %s32_s25, 10240  ;;  %p1022_p4 = scmp.lt.s32.totalorder %s32_s25, %s32_s25 }
   0xb   :  { %p1018_p3 = scmp.ne.s32.totalorder %s32_s25, %s1017_s10  ;;  %p1023_p5 = scmp.lt.s32.totalorder %s1017_s10, %s1017_s10 }
   0xd   :  { %p1024_p6 = por %p1023_p5, %p1022_p4 }
   0xf   :  { %p1025_p7 = pnand %p1024_p6, %p1018_p3 }
  0x11   :  { %1028 = shalt.err (!%p1025_p7)
}
  0x12   :  { %s1126_s11 = smov 128   ;;  %s1127_s12 = smov 8  }
  0x13   :  { %37 = dma.hbm_to_vmem [thread:$0]  %s1281_s1, 10240, %s32_s25, [#allocation6], %s1126_s11, %s1126_s11, %s1127_s12  }
  0x14   :  { %s1128_s15 = smov [#allocation2]   ;;  %s1129_s17 = smov [#allocation7]  }
  0x15   :  { %s22_s16 = sshll.u32 %s1128_s15, 4  ;;  %s45_s18 = sshll.u32 %s1129_s17, 4  ;;  %s23_s16 = int_to_ptr.vmem [resolvable:$true] %s22_s16  ;;  %s46_s18 = int_to_ptr.vmem [resolvable:$true] %s45_s18 }
  0x16   :  { %s1029_s21 = scalar_lea.hbm %s1280_s0, 640 }
  0x17   :  { %p1030_p8 = scmp.ne.s32.totalorder %s1280_s0, %s1029_s21  ;;  %p1033_p9 = scmp.lt.u32.totalorder %s1029_s21, %s1280_s0 }
  0x19   :  { %p1035_p10 = pnand %p1033_p9, %p1030_p8 }
  0x1b   :  { %1038 = shalt.err (!%p1035_p10)
}
  0x1c   :  { %s1039_s1 = scalar_lea.vmem %s23_s16, 640  ;;  %p1044_p12 = scmp.lt.s32.totalorder %s23_s16, %s23_s16 }
  0x1d   :  { %p1040_p11 = scmp.ne.s32.totalorder %s23_s16, %s1039_s1  ;;  %p1045_p13 = scmp.lt.s32.totalorder %s1039_s1, %s1039_s1 }
  0x1f   :  { %p1046_p0 = por %p1045_p13, %p1044_p12 }
  0x21   :  { %p1047_p1 = pnand %p1046_p0, %p1040_p11 }
  0x23   :  { %1050 = shalt.err (!%p1047_p1)
}
  0x24   :  { %25 = dma.hbm_to_vmem [thread:$0]  %s1280_s0, 640, %s23_s16, [#allocation3]  }
  0x25   :  { %s1051_s30 = scalar_lea.hbm %s1283_s3, 2048 }
  0x26   :  { %p1052_p2 = scmp.ne.s32.totalorder %s1283_s3, %s1051_s30  ;;  %p1055_p3 = scmp.lt.u32.totalorder %s1051_s30, %s1283_s3 }
  0x28   :  { %p1057_p4 = pnand %p1055_p3, %p1052_p2 }
  0x2a   :  { %1060 = shalt.err (!%p1057_p4)
}
  0x2b   :  { %s1061_s14 = scalar_lea.vmem %s46_s18, 2048  ;;  %p1066_p6 = scmp.lt.s32.totalorder %s46_s18, %s46_s18 }
  0x2c   :  { %p1062_p5 = scmp.ne.s32.totalorder %s46_s18, %s1061_s14  ;;  %p1067_p7 = scmp.lt.s32.totalorder %s1061_s14, %s1061_s14 }
  0x2e   :  { %p1068_p8 = por %p1067_p7, %p1066_p6 }
  0x30   :  { %p1069_p9 = pnand %p1068_p8, %p1062_p5 }
  0x32   :  { %1072 = shalt.err (!%p1069_p9)
}
  0x33   :  { %51 = dma.hbm_to_vmem [thread:$0]  %s1283_s3, 2048, %s46_s18, [#allocation6], %s1126_s11, %s1126_s11, %s1127_s12  }
  0x34   :  { %s1130_s16 = smov [#allocation8]   ;;  %s1073_s21 = scalar_lea.hbm %s1285_s5, 2048 }
  0x35   :  { %s59_s17 = sshll.u32 %s1130_s16, 4  ;;  %p1074_p10 = scmp.ne.s32.totalorder %s1285_s5, %s1073_s21  ;;  %s60_s17 = int_to_ptr.vmem [resolvable:$true] %s59_s17 }
  0x36   :  { %p1077_p11 = scmp.lt.u32.totalorder %s1073_s21, %s1285_s5 }
  0x38   :  { %p1079_p12 = pnand %p1077_p11, %p1074_p10 }
  0x3a   :  { %1082 = shalt.err (!%p1079_p12)
}
  0x3b   :  { %s1083_s1 = scalar_lea.vmem %s60_s17, 2048  ;;  %p1088_p0 = scmp.lt.s32.totalorder %s60_s17, %s60_s17 }
  0x3c   :  { %p1084_p13 = scmp.ne.s32.totalorder %s60_s17, %s1083_s1  ;;  %p1089_p1 = scmp.lt.s32.totalorder %s1083_s1, %s1083_s1 }
  0x3e   :  { %p1090_p2 = por %p1089_p1, %p1088_p0 }
  0x40   :  { %p1091_p3 = pnand %p1090_p2, %p1084_p13 }
  0x42   :  { %1094 = shalt.err (!%p1091_p3)
}
  0x43   :  { %65 = dma.hbm_to_vmem [thread:$0]  %s1285_s5, 2048, %s60_s17, [#allocation9], %s1126_s11, %s1126_s11, %s1127_s12  }
  0x44   :  { %1117 = dma.done.wait [#allocation3], 640  }
  0x45   :  { %1118 = vsyncadd [#allocation3], 4294966656 }
  0x46   :  { %1119 = dma.done.wait [#allocation6], 12288  }
  0x47   :  { %1120 = vsyncadd [#allocation6], 4294955008 }
  0x48   :  { %1121 = dma.done.wait [#allocation9], 2048  }
  0x49   :  { %1122 = vsyncadd [#allocation9], 4294965248  ;;  %v101_v0 = vld [vmem:[#allocation5 + $0x80] sm:$0xff]  ;;  %v102_v1 = vld [vmem:[#allocation5 + $0x88] sm:$0xff]  ;;  %vm1132_vm0 = vmmov 0   ;;  %s1134_s27 = smov [#allocation10]  }
  0x4a   :  { %v85_v2 = vld [vmem:[#allocation5] sm:$0xff]  ;;  %v857_v3 = vpack.c.bf16 %v102_v1, %v101_v0  ;;  %v86_v4 = vld [vmem:[#allocation5 + $0x8] sm:$0xff]  ;;  %v103_v11 = vld [vmem:[#allocation5 + $0x90] sm:$0xff]  ;;  %s617_s28 = sshll.u32 %s1134_s27, 4  ;;  %s618_s28 = int_to_ptr.vmem [resolvable:$true] %s617_s28 }
  0x4b   :  { %v133_v5 = vld [vmem:[#allocation5 + $0x180] sm:$0xff]  ;;  %v134_v6 = vld [vmem:[#allocation5 + $0x188] sm:$0xff]  ;;  %v859_v7 = vpack.c.bf16 %v86_v4, %v85_v2  ;;  %v104_v13 = vld [vmem:[#allocation5 + $0x98] sm:$0xff]  ;;  %s1095_s29 = scalar_lea.vmem %s618_s28, 128  ;;  %p1100_p5 = scmp.lt.s32.totalorder %s618_s28, %s618_s28 }
  0x4c   :  { %v889_v8 = vpack.c.bf16 %v134_v6, %v133_v5  ;;  %v117_v9 = vld [vmem:[#allocation5 + $0x100] sm:$0xff]  ;;  %v118_v10 = vld [vmem:[#allocation5 + $0x108] sm:$0xff]  ;;  %858 = vmatprep.subr.bf16.mxu0 %v857_v3  ;;  %v87_v14 = vld [vmem:[#allocation5 + $0x10] sm:$0xff]  ;;  %v861_v16 = vpack.c.bf16 %v104_v13, %v103_v11  ;;  %p1096_p4 = scmp.ne.s32.totalorder %s618_s28, %s1095_s29  ;;  %p1101_p6 = scmp.lt.s32.totalorder %s1095_s29, %s1095_s29 }
  0x4d   :  { %v891_v12 = vpack.c.bf16 %v118_v10, %v117_v9  ;;  %v88_v15 = vld [vmem:[#allocation5 + $0x18] sm:$0xff]  ;;  %860 = vmatpush3.bf16.msra.mxu0 %v859_v7  ;;  %v135_v18 = vld [vmem:[#allocation5 + $0x190] sm:$0xff]  ;;  %v105_v23 = vld [vmem:[#allocation5 + $0xa0] sm:$0xff] }
  0x4e   :  { %890 = vmatprep.subr.bf16.mxu1 %v889_v8  ;;  %v863_v17 = vpack.c.bf16 %v88_v15, %v87_v14  ;;  %v136_v19 = vld [vmem:[#allocation5 + $0x198] sm:$0xff]  ;;  %v119_v20 = vld [vmem:[#allocation5 + $0x110] sm:$0xff]  ;;  %v106_v24 = vld [vmem:[#allocation5 + $0xa8] sm:$0xff]  ;;  %862 = vmatprep.subr.bf16.mxu0 %v861_v16  ;;  %p1102_p7 = por %p1101_p6, %p1100_p5 }
  0x4f   :  { %892 = vmatpush3.bf16.msra.mxu1 %v891_v12  ;;  %v893_v21 = vpack.c.bf16 %v136_v19, %v135_v18  ;;  %v120_v22 = vld [vmem:[#allocation5 + $0x118] sm:$0xff]  ;;  %v865_v26 = vpack.c.bf16 %v106_v24, %v105_v23  ;;  %v89_v27 = vld [vmem:[#allocation5 + $0x20] sm:$0xff]  ;;  %v90_v28 = vld [vmem:[#allocation5 + $0x28] sm:$0xff] }
  0x50   :  { %v895_v25 = vpack.c.bf16 %v120_v22, %v119_v20  ;;  %v137_v29 = vld [vmem:[#allocation5 + $0x1a0] sm:$0xff]  ;;  %v138_v30 = vld [vmem:[#allocation5 + $0x1a8] sm:$0xff]  ;;  %v867_v33 = vpack.c.bf16 %v90_v28, %v89_v27  ;;  %v107_v35 = vld [vmem:[#allocation5 + $0xb0] sm:$0xff]  ;;  %p1103_p8 = pnand %p1102_p7, %p1096_p4 }
  0x51   :  { %894 = vmatprep.subr.bf16.mxu1 %v893_v21  ;;  %v121_v31 = vld [vmem:[#allocation5 + $0x120] sm:$0xff]  ;;  %v122_v32 = vld [vmem:[#allocation5 + $0x128] sm:$0xff]  ;;  %864 = vmatpush3.bf16.msra.mxu0 %v863_v17  ;;  %v897_v34 = vpack.c.bf16 %v138_v30, %v137_v29  ;;  %v108_v36 = vld [vmem:[#allocation5 + $0xb8] sm:$0xff] }
  0x52   :  { %v91_v37 = vld [vmem:[#allocation5 + $0x30] sm:$0xff]  ;;  %866 = vmatprep.subr.bf16.mxu0 %v865_v26  ;;  %v899_v38 = vpack.c.bf16 %v122_v32, %v121_v31  ;;  %v869_v39 = vpack.c.bf16 %v108_v36, %v107_v35  ;;  %v92_v40 = vld [vmem:[#allocation5 + $0x38] sm:$0xff]  ;;  %v109_v46 = vld [vmem:[#allocation5 + $0xc0] sm:$0xff] }
  0x53   :  { %896 = vmatpush3.bf16.msra.mxu1 %v895_v25  ;;  %v139_v41 = vld [vmem:[#allocation5 + $0x1b0] sm:$0xff]  ;;  %v140_v42 = vld [vmem:[#allocation5 + $0x1b8] sm:$0xff]  ;;  %v110_v47 = vld [vmem:[#allocation5 + $0xc8] sm:$0xff]  ;;  %v871_v48 = vpack.c.bf16 %v92_v40, %v91_v37 }
  0x54   :  { %898 = vmatprep.subr.bf16.mxu1 %v897_v34  ;;  %v901_v43 = vpack.c.bf16 %v140_v42, %v139_v41  ;;  %v123_v44 = vld [vmem:[#allocation5 + $0x130] sm:$0xff]  ;;  %v124_v45 = vld [vmem:[#allocation5 + $0x138] sm:$0xff]  ;;  %v141_v49 = vld [vmem:[#allocation5 + $0x1c0] sm:$0xff]  ;;  %v873_v52 = vpack.c.bf16 %v110_v47, %v109_v46 }
  0x55   :  { %868 = vmatpush3.bf16.msra.mxu0 %v867_v33  ;;  %v142_v50 = vld [vmem:[#allocation5 + $0x1c8] sm:$0xff]  ;;  %v903_v51 = vpack.c.bf16 %v124_v45, %v123_v44  ;;  %v93_v53 = vld [vmem:[#allocation5 + $0x40] sm:$0xff]  ;;  %v111_v58 = vld [vmem:[#allocation5 + $0xd0] sm:$0xff]  ;;  %v1133_v45 = vmov 0.0  }
  0x56   :  { %870 = vmatprep.subr.bf16.mxu0 %v869_v39  ;;  %v94_v54 = vld [vmem:[#allocation5 + $0x48] sm:$0xff]  ;;  %v125_v55 = vld [vmem:[#allocation5 + $0x140] sm:$0xff]  ;;  %v905_v56 = vpack.c.bf16 %v142_v50, %v141_v49  ;;  %v112_v59 = vld [vmem:[#allocation5 + $0xd8] sm:$0xff] }
  0x57   :  { %900 = vmatpush3.bf16.msra.mxu1 %v899_v38  ;;  %v126_v57 = vld [vmem:[#allocation5 + $0x148] sm:$0xff]  ;;  %v143_v60 = vld [vmem:[#allocation5 + $0x1d0] sm:$0xff]  ;;  %v144_v61 = vld [vmem:[#allocation5 + $0x1d8] sm:$0xff]  ;;  %v875_v62 = vpack.c.bf16 %v94_v54, %v93_v53  ;;  %v877_v0 = vpack.c.bf16 %v112_v59, %v111_v58  ;;  %v1131_v38 = vmov 0.0|0.0  }
  0x58   :  { %902 = vmatprep.subr.bf16.mxu1 %v901_v43  ;;  %v907_v63 = vpack.c.bf16 %v126_v57, %v125_v55  ;;  %v95_v1 = vld [vmem:[#allocation5 + $0x50] sm:$0xff]  ;;  %v96_v2 = vld [vmem:[#allocation5 + $0x58] sm:$0xff]  ;;  %v909_v4 = vpack.c.bf16 %v144_v61, %v143_v60  ;;  %v113_v6 = vld [vmem:[#allocation5 + $0xe0] sm:$0xff] }
  0x59   :  { %872 = vmatpush3.bf16.msra.mxu0 %v871_v48  ;;  %v127_v3 = vld [vmem:[#allocation5 + $0x150] sm:$0xff]  ;;  %v128_v5 = vld [vmem:[#allocation5 + $0x158] sm:$0xff]  ;;  %v114_v7 = vld [vmem:[#allocation5 + $0xe8] sm:$0xff]  ;;  %v879_v10 = vpack.c.bf16 %v96_v2, %v95_v1 }
  0x5a   :  { %874 = vmatprep.subr.bf16.mxu0 %v873_v52  ;;  %v145_v8 = vld [vmem:[#allocation5 + $0x1e0] sm:$0xff]  ;;  %v146_v9 = vld [vmem:[#allocation5 + $0x1e8] sm:$0xff]  ;;  %v911_v13 = vpack.c.bf16 %v128_v5, %v127_v3  ;;  %v881_v14 = vpack.c.bf16 %v114_v7, %v113_v6  ;;  %v115_v19 = vld [vmem:[#allocation5 + $0xf0] sm:$0xff] }
  0x5b   :  { %904 = vmatpush3.bf16.msra.mxu1 %v903_v51  ;;  %v97_v11 = vld [vmem:[#allocation5 + $0x60] sm:$0xff]  ;;  %v98_v15 = vld [vmem:[#allocation5 + $0x68] sm:$0xff]  ;;  %v913_v18 = vpack.c.bf16 %v146_v9, %v145_v8  ;;  %v116_v20 = vld [vmem:[#allocation5 + $0xf8] sm:$0xff] }
  0x5c   :  { %906 = vmatprep.subr.bf16.mxu1 %v905_v56  ;;  %v81_v12 = vld [vmem:[#allocation2 + $0x8] sm:$0xff]  ;;  %v130_v17 = vld [vmem:[#allocation5 + $0x168] sm:$0xff]  ;;  %v83_v21 = vld [vmem:[#allocation2 + $0x18] sm:$0xff]  ;;  %v883_v24 = vpack.c.bf16 %v98_v15, %v97_v11  ;;  %v885_v26 = vpack.c.bf16 %v116_v20, %v115_v19 }
  0x5d   :  { %876 = vmatpush3.bf16.msra.mxu0 %v875_v62  ;;  %v129_v16 = vld [vmem:[#allocation5 + $0x160] sm:$0xff]  ;;  %236 = vmatprep.mubr.f32.mxu0 %v81_v12  ;;  %v147_v22 = vld [vmem:[#allocation5 + $0x1f0] sm:$0xff]  ;;  %v148_v23 = vld [vmem:[#allocation5 + $0x1f8] sm:$0xff] }
  0x5e   :  { %878 = vmatprep.subr.bf16.mxu0 %v877_v0  ;;  %306 = vmatprep.mubr.f32.mxu1 %v83_v21  ;;  %v915_v25 = vpack.c.bf16 %v130_v17, %v129_v16  ;;  %v99_v27 = vld [vmem:[#allocation5 + $0x70] sm:$0xff]  ;;  %v100_v28 = vld [vmem:[#allocation5 + $0x78] sm:$0xff]  ;;  %v917_v29 = vpack.c.bf16 %v148_v23, %v147_v22  ;;  %v149_v34 = vld [vmem:[#allocation5 + $0x200] sm:$0xff] }
  0x5f   :  { %908 = vmatpush3.bf16.msra.mxu1 %v907_v63  ;;  %v131_v30 = vld [vmem:[#allocation5 + $0x170] sm:$0xff]  ;;  %v132_v31 = vld [vmem:[#allocation5 + $0x178] sm:$0xff]  ;;  %v887_v32 = vpack.c.bf16 %v100_v28, %v99_v27  ;;  %v150_v35 = vld [vmem:[#allocation5 + $0x208] sm:$0xff] }
  0x60   :  { %910 = vmatprep.subr.bf16.mxu1 %v909_v4  ;;  %v919_v33 = vpack.c.bf16 %v132_v31, %v131_v30  ;;  %v80_v36 = vld [vmem:[#allocation2] sm:$0xff]  ;;  %v922_v37 = vpack.c.bf16 %v150_v35, %v149_v34  ;;  %v82_v39 = vld [vmem:[#allocation2 + $0x10] sm:$0xff]  ;;  %v151_v40 = vld [vmem:[#allocation5 + $0x210] sm:$0xff] }
  0x61   :  { %880 = vmatpush3.bf16.msra.mxu0 %v879_v10  ;;  %v152_v41 = vld [vmem:[#allocation5 + $0x218] sm:$0xff]  ;;  %v153_v43 = vld [vmem:[#allocation5 + $0x220] sm:$0xff]  ;;  %v154_v44 = vld [vmem:[#allocation5 + $0x228] sm:$0xff] }
  0x62   :  { %882 = vmatprep.subr.bf16.mxu0 %v881_v14  ;;  %v925_v42 = vpack.c.bf16 %v152_v41, %v151_v40  ;;  %v928_v46 = vpack.c.bf16 %v154_v44, %v153_v43  ;;  %v155_v47 = vld [vmem:[#allocation5 + $0x230] sm:$0xff]  ;;  %v156_v48 = vld [vmem:[#allocation5 + $0x238] sm:$0xff]  ;;  %v157_v50 = vld [vmem:[#allocation5 + $0x240] sm:$0xff] }
  0x63   :  { %912 = vmatpush3.bf16.msra.mxu1 %v911_v13  ;;  %v931_v49 = vpack.c.bf16 %v156_v48, %v155_v47  ;;  %v158_v51 = vld [vmem:[#allocation5 + $0x248] sm:$0xff]  ;;  %v159_v53 = vld [vmem:[#allocation5 + $0x250] sm:$0xff]  ;;  %v160_v54 = vld [vmem:[#allocation5 + $0x258] sm:$0xff] }
  0x64   :  { %914 = vmatprep.subr.bf16.mxu1 %v913_v18  ;;  %v934_v52 = vpack.c.bf16 %v158_v51, %v157_v50  ;;  %v937_v55 = vpack.c.bf16 %v160_v54, %v159_v53  ;;  %v161_v56 = vld [vmem:[#allocation5 + $0x260] sm:$0xff]  ;;  %v162_v57 = vld [vmem:[#allocation5 + $0x268] sm:$0xff]  ;;  %v163_v59 = vld [vmem:[#allocation5 + $0x270] sm:$0xff] }
  0x65   :  { %884 = vmatpush3.bf16.msra.mxu0 %v883_v24  ;;  %v940_v58 = vpack.c.bf16 %v162_v57, %v161_v56  ;;  %v164_v60 = vld [vmem:[#allocation5 + $0x278] sm:$0xff]  ;;  %v401_v63 = vld [vmem:[#allocation7] sm:$0xff]  ;;  %v402_v0 = vld [vmem:[#allocation7 + $0x8] sm:$0xff] }
  0x66   :  { %886 = vmatprep.subr.bf16.mxu0 %v885_v26  ;;  %v943_v61 = vpack.c.bf16 %v164_v60, %v163_v59  ;;  %v84_v62 = vld [vmem:[#allocation2 + $0x20] sm:$0xff]  ;;  %v946_v1 = vpack.c.bf16 %v402_v0, %v401_v63  ;;  %v403_v2 = vld [vmem:[#allocation7 + $0x10] sm:$0xff]  ;;  %v405_v5 = vld [vmem:[#allocation7 + $0x20] sm:$0xff] }
  0x67   :  { %916 = vmatpush3.bf16.msra.mxu1 %v915_v25  ;;  %v404_v3 = vld [vmem:[#allocation7 + $0x18] sm:$0xff]  ;;  %v406_v6 = vld [vmem:[#allocation7 + $0x28] sm:$0xff]  ;;  %v407_v8 = vld [vmem:[#allocation7 + $0x30] sm:$0xff] }
  0x68   :  { %918 = vmatprep.subr.bf16.mxu1 %v917_v29  ;;  %v949_v4 = vpack.c.bf16 %v404_v3, %v403_v2  ;;  %v952_v7 = vpack.c.bf16 %v406_v6, %v405_v5  ;;  %v408_v9 = vld [vmem:[#allocation7 + $0x38] sm:$0xff]  ;;  %v409_v11 = vld [vmem:[#allocation7 + $0x40] sm:$0xff]  ;;  %v410_v12 = vld [vmem:[#allocation7 + $0x48] sm:$0xff] }
  0x69   :  { %888 = vmatpush3.bf16.msra.mxu0 %v887_v32  ;;  %v955_v10 = vpack.c.bf16 %v408_v9, %v407_v8  ;;  %v958_v13 = vpack.c.bf16 %v410_v12, %v409_v11  ;;  %v411_v14 = vld [vmem:[#allocation7 + $0x50] sm:$0xff]  ;;  %v412_v15 = vld [vmem:[#allocation7 + $0x58] sm:$0xff]  ;;  %v413_v17 = vld [vmem:[#allocation7 + $0x60] sm:$0xff] }
  0x6a   :  { %921 = vmatprep.subr.bf16.mxu0 %v1131_v38  ;;  %v961_v16 = vpack.c.bf16 %v412_v15, %v411_v14  ;;  %v414_v18 = vld [vmem:[#allocation7 + $0x68] sm:$0xff]  ;;  %v415_v20 = vld [vmem:[#allocation7 + $0x70] sm:$0xff]  ;;  %v416_v21 = vld [vmem:[#allocation7 + $0x78] sm:$0xff] }
  0x6b   :  { %920 = vmatpush3.bf16.msra.mxu1 %v919_v33  ;;  %v964_v19 = vpack.c.bf16 %v414_v18, %v413_v17  ;;  %v967_v22 = vpack.c.bf16 %v416_v21, %v415_v20  ;;  %v628_v24 = vld [vmem:[%s1282_s2] ss:$0 sm:$0xff]  ;;  %v518_v56 = vld [vmem:[#allocation8 + $0x8] sm:$0xff]  ;;  %v523_v0 = vld [vmem:[#allocation8 + $0x30] sm:$0xff] }
  0x6c   :  { %945 = vmatprep.subr.bf16.mxu1 %v1131_v38  ;;  %237 = vmatmul.mubr.f32.vlgmr.msra.gmra.mrb[0].mxu0 %v80_v36  ;;  %v520_v59 = vld [vmem:[#allocation8 + $0x18] sm:$0xff]  ;;  %v525_v3 = vld [vmem:[#allocation8 + $0x40] sm:$0xff]  ;;  %v527_v6 = vld [vmem:[#allocation8 + $0x50] sm:$0xff] }
  0x6d   :  { %923 = vmatpush3.bf16.msra.mxu0 %v922_v37  ;;  %784 = vmatprep.mubr.msk.f32.mxu0 %vm1132_vm0, %v1133_v45  ;;  %v529_v9 = vld [vmem:[#allocation8 + $0x60] sm:$0xff]  ;;  %v531_v12 = vld [vmem:[#allocation8 + $0x70] sm:$0xff]  ;;  %v629_v15 = vld [vmem:[%s1284_s4] ss:$0 sm:$0xff] }
  0x6e   :  { %307 = vmatmul.mubr.f32.vlgmr.msra.gmra.mrb[0].mxu1 %v82_v39  ;;  %924 = vmatprep.subr.bf16.mxu0 %v1131_v38 }
  0x6f   :  { %819 = vmatprep.mubr.msk.f32.mxu1 %vm1132_vm0, %v1133_v45  ;;  %947 = vmatpush3.bf16.msra.mxu1 %v946_v1  ;;  %v524_v1 = vld [vmem:[#allocation8 + $0x38] sm:$0xff] }
  0x70   :  { %948 = vmatprep.subr.bf16.mxu1 %v1131_v38  ;;  %v979_v2 = vpack.c.bf16 %v524_v1, %v523_v0 }
  0x71   :  { %926 = vmatpush3.bf16.msra.mxu0 %v925_v42 }
  0x72   :  { %927 = vmatprep.subr.bf16.mxu0 %v1131_v38 }
  0x73   :  { %950 = vmatpush3.bf16.msra.mxu1 %v949_v4  ;;  %v526_v4 = vld [vmem:[#allocation8 + $0x48] sm:$0xff] }
  0x74   :  { %951 = vmatprep.subr.bf16.mxu1 %v1131_v38  ;;  %v982_v5 = vpack.c.bf16 %v526_v4, %v525_v3 }
  0x75   :  { %929 = vmatpush3.bf16.msra.mxu0 %v928_v46 }
  0x76   :  { %930 = vmatprep.subr.bf16.mxu0 %v1131_v38 }
  0x77   :  { %953 = vmatpush3.bf16.msra.mxu1 %v952_v7  ;;  %v528_v7 = vld [vmem:[#allocation8 + $0x58] sm:$0xff] }
  0x78   :  { %954 = vmatprep.subr.bf16.mxu1 %v1131_v38  ;;  %v985_v8 = vpack.c.bf16 %v528_v7, %v527_v6 }
  0x79   :  { %932 = vmatpush3.bf16.msra.mxu0 %v931_v49 }
  0x7a   :  { %933 = vmatprep.subr.bf16.mxu0 %v1131_v38 }
  0x7b   :  { %956 = vmatpush3.bf16.msra.mxu1 %v955_v10  ;;  %v530_v10 = vld [vmem:[#allocation8 + $0x68] sm:$0xff] }
  0x7c   :  { %957 = vmatprep.subr.bf16.mxu1 %v1131_v38  ;;  %v988_v11 = vpack.c.bf16 %v530_v10, %v529_v9 }
  0x7d   :  { %935 = vmatpush3.bf16.msra.mxu0 %v934_v52 }
  0x7e   :  { %936 = vmatprep.subr.bf16.mxu0 %v1131_v38 }
  0x7f   :  { %959 = vmatpush3.bf16.msra.mxu1 %v958_v13  ;;  %v532_v13 = vld [vmem:[#allocation8 + $0x78] sm:$0xff] }
  0x80   :  { %960 = vmatprep.subr.bf16.mxu1 %v1131_v38  ;;  %v991_v14 = vpack.c.bf16 %v532_v13, %v531_v12 }
  0x81   :  { %938 = vmatpush3.bf16.msra.mxu0 %v937_v55  ;;  %v517_v55 = vld [vmem:[#allocation8] sm:$0xff] }
  0x82   :  { %939 = vmatprep.subr.bf16.mxu0 %v1131_v38  ;;  %v970_v57 = vpack.c.bf16 %v518_v56, %v517_v55 }
  0x83   :  { %962 = vmatpush3.bf16.msra.mxu1 %v961_v16 }
  0x84   :  { %963 = vmatprep.subr.bf16.mxu1 %v1131_v38 }
  0x85   :  { %941 = vmatpush3.bf16.msra.mxu0 %v940_v58  ;;  %v519_v58 = vld [vmem:[#allocation8 + $0x10] sm:$0xff] }
  0x86   :  { %942 = vmatprep.subr.bf16.mxu0 %v1131_v38  ;;  %v973_v60 = vpack.c.bf16 %v520_v59, %v519_v58 }
  0x87   :  { %965 = vmatpush3.bf16.msra.mxu1 %v964_v19 }
  0x88   :  { %966 = vmatprep.subr.bf16.mxu1 %v1131_v38 }
  0x89   :  { %944 = vmatpush3.bf16.msra.mxu0 %v943_v61  ;;  %v521_v61 = vld [vmem:[#allocation8 + $0x20] sm:$0xff] }
  0x8a   :  { %969 = vmatprep.subr.bf16.mxu0 %v1131_v38 }
  0x8b   :  { %968 = vmatpush3.bf16.msra.mxu1 %v967_v22 }
  0x8c   :  { %785 = vmatmul.mubr.f32.vlgmr.msra.gmra.mrb[2].mxu0 %v84_v62  ;;  %v522_v62 = vld [vmem:[#allocation8 + $0x28] sm:$0xff] }
  0x8d   :  { %854 = vmatprep.mubr.msk.f32.mxu0 %vm1132_vm0, %v1133_v45  ;;  %971 = vmatpush3.bf16.msra.mxu0 %v970_v57  ;;  %v976_v63 = vpack.c.bf16 %v522_v62, %v521_v61 }
  0x8e   :  { %972 = vmatprep.subr.bf16.mxu0 %v1131_v38 }
  0x91   :  { %974 = vmatpush3.bf16.msra.mxu0 %v973_v60 }
  0x92   :  { %975 = vmatprep.subr.bf16.mxu0 %v1131_v38 }
  0x95   :  { %977 = vmatpush3.bf16.msra.mxu0 %v976_v63 }
  0x96   :  { %978 = vmatprep.subr.bf16.mxu0 %v1131_v38 }
  0x99   :  { %980 = vmatpush3.bf16.msra.mxu0 %v979_v2 }
  0x9a   :  { %981 = vmatprep.subr.bf16.mxu0 %v1131_v38 }
  0x9d   :  { %983 = vmatpush3.bf16.msra.mxu0 %v982_v5 }
  0x9e   :  { %984 = vmatprep.subr.bf16.mxu0 %v1131_v38 }
  0xa1   :  { %986 = vmatpush3.bf16.msra.mxu0 %v985_v8 }
  0xa2   :  { %987 = vmatprep.subr.bf16.mxu0 %v1131_v38 }
  0xa5   :  { %989 = vmatpush3.bf16.msra.mxu0 %v988_v11 }
  0xa6   :  { %990 = vmatprep.subr.bf16.mxu0 %v1131_v38 }
  0xa9   :  { %992 = vmatpush3.bf16.msra.mxu0 %v991_v14 }
 0x13f   :  { %v663_v23 = vpop.f32.mrb[0].mxu0 }
 0x140   :  { %v664_v25 = vpop.f32.mrb[1].mxu0 }
 0x141   :  { %v698_v26 = vpop.f32.mrb[0].mxu1  ;;  %v665_v27 = vadd.f32 %v664_v25, %v663_v23 }
 0x142   :  { %v699_v28 = vpop.f32.mrb[1].mxu1 }
 0x143   :  { %v700_v29 = vadd.f32 %v699_v28, %v698_v26  ;;  %v239_v30 = vadd.f32 %v665_v27, %v628_v24 }
 0x145   :  { %v309_v31 = vadd.f32 %v700_v29, %v239_v30 }
 0x15f   :  { %v378_v32 = vpop.f32.mrb[2].mxu0 }
 0x160   :  { %v379_v33 = vadd.f32 %v378_v32, %v309_v31  ;;  %v786_v34 = vpop.f32.mrb[3].mxu0 }
 0x161   :  { %v511_v34 = vlaneseq }
 0x162   :  { %v382_v35 = vrot.slane %v379_v33, 4 }
 0x164   :  { %v383_v36 = vadd.f32 %v382_v35, %v379_v33  ;;  %v512_v35 = vand.u32 127, %v511_v34 }
 0x166   :  { %v384_v37 = vrot.slane %v383_v36, 2  ;;  %vm513_vm1 = vcmp.lt.s32.totalorder %v512_v35, 64 }
 0x168   :  { %v385_v39 = vadd.f32 %v384_v37, %v383_v36 }
 0x16a   :  { %v386_v40 = vrot.slane %v385_v39, 1 }
 0x16c   :  { %v387_v41 = vadd.f32 %v386_v40, %v385_v39 }
 0x16e   :  { %v388_v42 = vmul.f32 0.125, %v387_v41  ;;  %v630_v41 = vld [vmem:[%s1286_s6] ss:$0 sm:$0xff] }
 0x170   :  { %v389_v43 = vsub.f32 %v379_v33, %v388_v42 }
 0x172   :  { %v390_v44 = vmul.f32 %v389_v43, %v389_v43 }
 0x174   :  { %v391_v45 = vrot.slane %v390_v44, 4 }
 0x176   :  { %v392_v46 = vadd.f32 %v391_v45, %v390_v44 }
 0x178   :  { %v393_v47 = vrot.slane %v392_v46, 2 }
 0x17a   :  { %v394_v48 = vadd.f32 %v393_v47, %v392_v46 }
 0x17c   :  { %v395_v49 = vrot.slane %v394_v48, 1 }
 0x17e   :  { %v396_v50 = vadd.f32 %v395_v49, %v394_v48 }
 0x180   :  { %v397_v51 = vmul.f32 0.125, %v396_v50 }
 0x182   :  { %1003 = vrsqrt.f32 %v397_v51 }
 0x18c   :  { %v1004_v52 = vpop.eup %1003 }
 0x18d   :  { %v399_v53 = vmul.f32 %v1004_v52, %v389_v43 }
 0x18f   :  { %v400_v54 = vmax.f32 %v399_v53, 0.0 }
 0x191   :  { %820 = vmatmul.mubr.f32.vlgmr.msra.gmra.mrb[2].mxu1 %v400_v54 }
 0x264   :  { %v490_v16 = vpop.f32.mrb[2].mxu1 }
 0x265   :  { %v491_v17 = vadd.f32 %v629_v15, %v490_v16  ;;  %v821_v18 = vpop.f32.mrb[3].mxu1 }
 0x267   :  { %v494_v19 = vrot.slane %v491_v17, 4 }
 0x269   :  { %v495_v20 = vadd.f32 %v494_v19, %v491_v17 }
 0x26b   :  { %v496_v21 = vrot.slane %v495_v20, 2 }
 0x26d   :  { %v497_v22 = vadd.f32 %v496_v21, %v495_v20 }
 0x26f   :  { %v498_v23 = vrot.slane %v497_v22, 1 }
 0x271   :  { %v499_v24 = vadd.f32 %v498_v23, %v497_v22 }
 0x273   :  { %v500_v25 = vmul.f32 0.125, %v499_v24 }
 0x275   :  { %v501_v26 = vsub.f32 %v491_v17, %v500_v25 }
 0x277   :  { %v502_v38 = vmul.f32 %v501_v26, %v501_v26 }
 0x279   :  { %v503_v27 = vrot.slane %v502_v38, 4 }
 0x27b   :  { %v504_v28 = vadd.f32 %v503_v27, %v502_v38 }
 0x27d   :  { %v505_v29 = vrot.slane %v504_v28, 2 }
 0x27f   :  { %v506_v30 = vadd.f32 %v505_v29, %v504_v28 }
 0x281   :  { %v507_v31 = vrot.slane %v506_v30, 1 }
 0x283   :  { %v508_v32 = vadd.f32 %v507_v31, %v506_v30 }
 0x285   :  { %v509_v33 = vmul.f32 0.125, %v508_v32 }
 0x287   :  { %1005 = vrsqrt.f32 %v509_v33 }
 0x291   :  { %v1006_v36 = vpop.eup %1005 }
 0x292   :  { %v514_v37 = vsel %vm513_vm1, %v1006_v36, 0.0 }
 0x293   :  { %v515_v39 = vmul.f32 %v514_v37, %v501_v26 }
 0x295   :  { %v516_v40 = vmax.f32 %v515_v39, 0.0 }
 0x297   :  { %855 = vmatmul.mubr.f32.vlgmr.msra.gmra.mrb[4].mxu0 %v516_v40 }
 0x36a   :  { %v606_v42 = vpop.f32.mrb[4].mxu0 }
 0x36b   :  { %v607_v43 = vadd.f32 %v630_v41, %v606_v42  ;;  %v856_v44 = vpop.f32.mrb[5].mxu0 }
 0x36d   :  { %610 = vst [vmem:[#allocation10] sm:$0xff] %v607_v43 }
 0x36e   :  { %1106 = shalt.err (!%p1103_p8)
}
 0x36f   :  { %s1107_s9 = scalar_lea.hbm %s1287_s7, 128 }
 0x370   :  { %p1108_p9 = scmp.ne.s32.totalorder %s1287_s7, %s1107_s9  ;;  %p1111_p10 = scmp.lt.u32.totalorder %s1107_s9, %s1287_s7 }
 0x372   :  { %p1113_p11 = pnand %p1111_p10, %p1108_p9 }
 0x374   :  { %1116 = shalt.err (!%p1113_p11)
}
 0x375   :  { %620 = dma.vmem_to_hbm [thread:$0]  %s618_s28, 128, %s1287_s7, [#allocation4]  }
 0x376   :  { %1123 = dma.done.wait [#allocation4], 128  }
 0x377   :  { %1124 = vsyncadd [#allocation4], 4294967168 }
 0x378   :  { %624 = vsyncpa [#allocation3], 1 }
 0x379   :  { %625 = vsyncpa [#allocation6], 1 }
 0x37a   :  { %626 = vsyncpa [#allocation9], 1 }
 0x37b   :  { %627 = vsyncpa [#allocation4], 1 }

</bundles_post_ra>
